<compile_context>
chip_gen: v7x
topology: tpu7x:2x2x1
jax: 0.10.0
libtpu: 0.0.40
codegen_flags: <defaults>
</compile_context>

<pallas_src>
import functools

import jax
import jax.numpy as jnp
from jax import lax
from jax.experimental import pallas as pl
from jax.experimental.pallas import tpu as pltpu


_LANE = 128
_SUBLANE = 8


def _round_up(x, m):
    return ((x + m - 1) // m) * m


# ----------------------------------------------------------------------------
# Kernel 1: Dice statistics + BCE-with-logits partial sums.
# Layout (R, M) = (N*C, H*W); grid = (row blocks, spatial tiles).
# ----------------------------------------------------------------------------
def _dice_bce_kernel(pred_ref, truth_ref,
                     inter_o, psum_o, tsum_o, bce_o,
                     inter_acc, psum_acc, tsum_acc, bce_acc):
    m_step = pl.program_id(1)

    @pl.when(m_step == 0)
    def _init():
        inter_acc[...] = jnp.zeros_like(inter_acc)
        psum_acc[...] = jnp.zeros_like(psum_acc)
        tsum_acc[...] = jnp.zeros_like(tsum_acc)
        bce_acc[...] = jnp.zeros_like(bce_acc)

    x = pred_ref[...].astype(jnp.float32)    # logits,  (TR, TM)
    y = truth_ref[...].astype(jnp.float32)   # targets, (TR, TM), values in [0, 1]

    # One transcendental pass: e = exp(-|x|) feeds both sigmoid and BCE.
    e = jnp.exp(-jnp.abs(x))
    inv = pl.reciprocal(1.0 + e, approx=True)            # EUP reciprocal
    p = jnp.where(x >= 0.0, inv, e * inv)                 # sigmoid(x), overflow-free
    # numerically stable BCE with logits: max(x,0) - x*y + log(1 + exp(-|x|))
    bce = jnp.maximum(x, 0.0) - x * y + jnp.log(1.0 + e)

    # Pure VALU accumulation -- no cross-lane (XLU) reductions in the hot loop.
    inter_acc[...] += p * y
    psum_acc[...] += p
    tsum_acc[...] += y
    bce_acc[...] += bce

    @pl.when(m_step == pl.num_programs(1) - 1)
    def _finalize():
        inter_o[...] = jnp.sum(inter_acc[...], axis=-1, keepdims=True)
        psum_o[...] = jnp.sum(psum_acc[...], axis=-1, keepdims=True)
        tsum_o[...] = jnp.sum(tsum_acc[...], axis=-1, keepdims=True)
        bce_o[...] = jnp.sum(bce_acc[...], axis=-1, keepdims=True)


def _pick_row_tile(R):
    """Rows per block: a multiple of 8 dividing R (several blocks enable
    megacore sharding on v7x); otherwise fall back to the full row extent."""
    if R <= _SUBLANE or R % _SUBLANE != 0:
        return R
    for tr in (32, 24, 16, 8):
        if R % tr == 0:
            return tr
    return R


def _pick_tile_m(TR, M):
    """Lane-tile width: a multiple of 128, preferring a divisor of M (so no
    padding copy), capped so 2 double-buffered f32 inputs + 4 f32 accumulators
    stay well under the scoped-VMEM default on every chip (16 MiB on v5e)."""
    budget_bytes = 12 * 1024 * 1024
    # Per lane column: 2 inputs * 2 buffers * 4B + 4 accumulators * 4B = 32 B/row.
    per_col_bytes = 32 * max(TR, 1)
    cap = max(_LANE, min(32768, (budget_bytes // per_col_bytes) // _LANE * _LANE))
    m128 = _round_up(M, _LANE)
    if m128 <= cap:
        return m128
    for tm in range(cap, _LANE - 1, -_LANE):   # largest 128-multiple dividing M
        if M % tm == 0:
            return tm
    return cap                                  # falls back to the padding path


@jax.jit
def dice_bce_loss(pred, truth):
    """0.4 * DiceLoss(mode='multilabel', from_logits=True) + 0.6 * SoftBCEWithLogits."""
    N, C, H, W = pred.shape
    R = N * C
    M = H * W

    # Contiguous reshape only -- no HBM transpose of pred/truth.
    # (truth may be uint8/bool and pred bf16; the kernel upcasts to f32.)
    p2 = pred.reshape(R, M)
    t2 = truth.reshape(R, M)

    TR = _pick_row_tile(R)
    TM = _pick_tile_m(TR, M)
    m_pad = _round_up(M, TM)
    if m_pad != M:
        # Pad so every block is full: pred gets a very negative (but finite in
        # bf16/f16) logit and truth gets 0, so padded elements contribute
        # exactly zero to all four sums.
        p2 = jnp.pad(p2, ((0, 0), (0, m_pad - M)), constant_values=-1e4)
        t2 = jnp.pad(t2, ((0, 0), (0, m_pad - M)), constant_values=0)

    grid = (R // TR, m_pad // TM)
    out_shapes = tuple(jax.ShapeDtypeStruct((R, 1), jnp.float32) for _ in range(4))

    inter_r, psum_r, tsum_r, bce_r = pl.pallas_call(
        _dice_bce_kernel,
        out_shape=out_shapes,
        grid=grid,
        in_specs=[
            pl.BlockSpec((TR, TM), lambda r, m: (r, m)),
            pl.BlockSpec((TR, TM), lambda r, m: (r, m)),
        ],
        out_specs=tuple(pl.BlockSpec((TR, 1), lambda r, m: (r, 0)) for _ in range(4)),
        scratch_shapes=[pltpu.VMEM((TR, TM), jnp.float32) for _ in range(4)],
        compiler_params=pltpu.CompilerParams(
            dimension_semantics=("parallel", "arbitrary"),
        ),
    )(p2, t2)

    # Tiny finalization (C-sized arrays + scalars): fold the N batch rows of
    # each channel, then apply the smp-style Dice and mean BCE formulas.
    inter = jnp.sum(inter_r.reshape(N, C), axis=0)
    psum = jnp.sum(psum_r.reshape(N, C), axis=0)
    tsum = jnp.sum(tsum_r.reshape(N, C), axis=0)
    bce_sum = jnp.sum(bce_r)

    eps = 1e-7
    card = psum + tsum                                    # sum(p) + sum(y)
    dice_score = 2.0 * inter / jnp.maximum(card, eps)
    dice_per_class = (1.0 - dice_score) * (tsum > 0).astype(jnp.float32)
    dice_loss = jnp.mean(dice_per_class)

    bce_loss = bce_sum / (N * C * H * W)

    return 0.4 * dice_loss + 0.6 * bce_loss


# ----------------------------------------------------------------------------
# Kernel 2: vectorized SimCLR (NT-Xent) loss over [left; right] features.
# ----------------------------------------------------------------------------
def _simclr_kernel(out_ref, loss_ref, *, n, inv_tau):
    o = out_ref[...].astype(jnp.float32)                        # (2n, D)

    # Row-normalize with rsqrt (EUP); eps avoids NaN on an all-zero row.
    inv_norm = lax.rsqrt(jnp.sum(o * o, axis=1, keepdims=True) + 1e-12)
    o_n = o * inv_norm

    # Gram matrix on the MXU: bf16 operands, f32 accumulation.
    ob = o_n.astype(jnp.bfloat16)
    sim = jnp.einsum("id,jd->ij", ob, ob,
                     preferred_element_type=jnp.float32)         # (2n, 2n)

    # Denominator: row-sum of exp(sim/tau) minus the self-similarity term.
    # The self term is recomputed from the same bf16 operands so it matches the
    # Gram diagonal -- no (2n,2n) iota mask / select needed.
    ob32 = ob.astype(jnp.float32)
    self_sim = jnp.sum(ob32 * ob32, axis=1, keepdims=True)       # (2n, 1) ~ 1
    denom = (jnp.sum(jnp.exp(sim * inv_tau), axis=1, keepdims=True)
             - jnp.exp(self_sim * inv_tau))                      # (2n, 1)

    # Positive pairs: row k of the left half vs row k of the right half.
    pos = jnp.sum(o_n[:n] * o_n[n:], axis=1, keepdims=True)      # (n, 1)

    # -log(num/denom_l) - log(num/denom_r) = -2*pos/tau + log(denom_l) + log(denom_r)
    loss = (jnp.sum(jnp.log(denom)) - 2.0 * inv_tau * jnp.sum(pos)) / (2.0 * n)
    loss_ref[0, 0] = loss


@functools.partial(jax.jit, static_argnames=("tau",))
def simclr_loss(aux_features, tau=0.1):
    N, D = aux_features.shape
    n = N // 2                      # drops the last row when N is odd
    # Deinterleave (2k, 2k+1) pairs into [left; right] halves (small HBM
    # permutation; for very large feature matrices the pairing could instead be
    # read in-kernel with a strided pl.ds to avoid this copy).
    f = aux_features[: 2 * n].reshape(n, 2, D)
    out = jnp.concatenate([f[:, 0, :], f[:, 1, :]], axis=0)      # (2n, D)

    # TODO(synk): for very large 2n, stream the Gram matrix in column blocks
    # (flash-style online denominator accumulation) to fit v7x's 64 MiB VMEM.
    loss = pl.pallas_call(
        functools.partial(_simclr_kernel, n=n, inv_tau=1.0 / tau),
        out_shape=jax.ShapeDtypeStruct((1, 1), jnp.float32),
        in_specs=[pl.BlockSpec(memory_space=pltpu.MemorySpace.VMEM)],
        out_specs=pl.BlockSpec(memory_space=pltpu.MemorySpace.SMEM),
    )(out)
    return loss[0, 0]


# ----------------------------------------------------------------------------
# CombinedLoss.forward equivalent
# ----------------------------------------------------------------------------
def combined_loss(pred, truth, aux=None, aux_features=None):
    loss = None
    if pred is not None:
        loss = dice_bce_loss(pred, truth)
    if aux == "simclr":
        sc = simclr_loss(aux_features, tau=0.1)
        if pred is None:
            return sc
        return 0.9 * loss + 0.1 * sc, sc
    elif aux == "reg":
        # TODO(synk): the 'reg' branch is a bare `pass` in the reference module
        # (forward falls through and returns None), so there is nothing to run.
        return None
    else:
        return loss


if __name__ == "__main__":
    key = jax.random.PRNGKey(0)
    k1, k2, k3 = jax.random.split(key, 3)

    # pred/truth: NCHW segmentation logits / binary masks.
    pred = jax.random.normal(k1, (2, 4, 16, 16), dtype=jnp.float32)
    truth = (jax.random.uniform(k2, (2, 4, 16, 16)) > 0.5).astype(jnp.float32)
    # aux_features: (N, D) projection-head outputs -> N//2 positive pairs.
    aux_features = jax.random.normal(k3, (8, 32), dtype=jnp.float32)

    total_loss, simclr = combined_loss(pred, truth, aux="simclr",
                                       aux_features=aux_features)
    jax.block_until_ready((total_loss, simclr))

    seg_only = combined_loss(pred, truth)
    jax.block_until_ready(seg_only)

    print("KERNEL_OK")
</pallas_src>

<mosaic_0001>
module attributes {stable_mosaic.version = 11 : i64} {
  func.func @_dice_bce_kernel(%arg0: i32, %arg1: i32, %arg2: memref<8x256xf32, #tpu.memory_space<vmem>>, %arg3: memref<8x256xf32, #tpu.memory_space<vmem>>, %arg4: memref<8x1xf32, #tpu.memory_space<vmem>>, %arg5: memref<8x1xf32, #tpu.memory_space<vmem>>, %arg6: memref<8x1xf32, #tpu.memory_space<vmem>>, %arg7: memref<8x1xf32, #tpu.memory_space<vmem>>, %arg8: memref<8x256xf32, #tpu.memory_space<vmem>>, %arg9: memref<8x256xf32, #tpu.memory_space<vmem>>, %arg10: memref<8x256xf32, #tpu.memory_space<vmem>>, %arg11: memref<8x256xf32, #tpu.memory_space<vmem>>) attributes {dimension_semantics = [#tpu.dimension_semantics<parallel>, #tpu.dimension_semantics<arbitrary>], iteration_bounds = array<i64: 1, 1>, scalar_prefetch = 0 : i64, scratch_operands = 4 : i64, tpu.core_type = #tpu.core_type<tc>, window_params = [{transform_indices = @transform_0, window_bounds = array<i64: 8, 256>}, {transform_indices = @transform_1, window_bounds = array<i64: 8, 256>}, {transform_indices = @transform_2, window_bounds = array<i64: 8, 1>}, {transform_indices = @transform_3, window_bounds = array<i64: 8, 1>}, {transform_indices = @transform_4, window_bounds = array<i64: 8, 1>}, {transform_indices = @transform_5, window_bounds = array<i64: 8, 1>}]} {
    %c0_i32 = arith.constant 0 : i32
    %0 = arith.cmpi eq, %arg1, %c0_i32 : i32
    %1 = arith.extui %0 : i1 to i32
    %c0_i32_0 = arith.constant 0 : i32
    %2 = arith.cmpi ne, %1, %c0_i32_0 : i32
    scf.if %2 {
      %cst_26 = arith.constant 0.000000e+00 : f32
      %40 = vector.broadcast %cst_26 : f32 to vector<8x256xf32>
      %c0_27 = arith.constant 0 : index
      %c0_28 = arith.constant 0 : index
      %41 = vector.load %arg8[%c0_27, %c0_28] : memref<8x256xf32, #tpu.memory_space<vmem>>, vector<8x256xf32>
      tpu.vector_store %arg8[%c0_27, %c0_28], %40 {strides = array<i32>} : memref<8x256xf32, #tpu.memory_space<vmem>>, vector<8x256xf32>,
      %cst_29 = arith.constant 0.000000e+00 : f32
      %42 = vector.broadcast %cst_29 : f32 to vector<8x256xf32>
      %c0_30 = arith.constant 0 : index
      %c0_31 = arith.constant 0 : index
      %43 = vector.load %arg9[%c0_30, %c0_31] : memref<8x256xf32, #tpu.memory_space<vmem>>, vector<8x256xf32>
      tpu.vector_store %arg9[%c0_30, %c0_31], %42 {strides = array<i32>} : memref<8x256xf32, #tpu.memory_space<vmem>>, vector<8x256xf32>,
      %cst_32 = arith.constant 0.000000e+00 : f32
      %44 = vector.broadcast %cst_32 : f32 to vector<8x256xf32>
      %c0_33 = arith.constant 0 : index
      %c0_34 = arith.constant 0 : index
      %45 = vector.load %arg10[%c0_33, %c0_34] : memref<8x256xf32, #tpu.memory_space<vmem>>, vector<8x256xf32>
      tpu.vector_store %arg10[%c0_33, %c0_34], %44 {strides = array<i32>} : memref<8x256xf32, #tpu.memory_space<vmem>>, vector<8x256xf32>,
      %cst_35 = arith.constant 0.000000e+00 : f32
      %46 = vector.broadcast %cst_35 : f32 to vector<8x256xf32>
      %c0_36 = arith.constant 0 : index
      %c0_37 = arith.constant 0 : index
      %47 = vector.load %arg11[%c0_36, %c0_37] : memref<8x256xf32, #tpu.memory_space<vmem>>, vector<8x256xf32>
      tpu.vector_store %arg11[%c0_36, %c0_37], %46 {strides = array<i32>} : memref<8x256xf32, #tpu.memory_space<vmem>>, vector<8x256xf32>,
    } else {
    }
    %c0 = arith.constant 0 : index
    %c0_1 = arith.constant 0 : index
    %3 = vector.load %arg2[%c0, %c0_1] : memref<8x256xf32, #tpu.memory_space<vmem>>, vector<8x256xf32>
    %c0_2 = arith.constant 0 : index
    %c0_3 = arith.constant 0 : index
    %4 = vector.load %arg3[%c0_2, %c0_3] : memref<8x256xf32, #tpu.memory_space<vmem>>, vector<8x256xf32>
    %5 = math.absf %3 : vector<8x256xf32>
    %cst = arith.constant 0.000000e+00 : f32
    %6 = vector.broadcast %cst : f32 to vector<8x256xf32>
    %7 = arith.subf %6, %5 : vector<8x256xf32>
    %8 = math.exp %7 : vector<8x256xf32>
    %cst_4 = arith.constant 1.000000e+00 : f32
    %9 = vector.broadcast %cst_4 : f32 to vector<8x256xf32>
    %10 = arith.addf %9, %8 : vector<8x256xf32>
    %11 = tpu.reciprocal %10 {approx = true} : vector<8x256xf32> -> vector<8x256xf32>
    %cst_5 = arith.constant 0.000000e+00 : f32
    %12 = vector.broadcast %cst_5 : f32 to vector<8x256xf32>
    %13 = arith.cmpf oge, %3, %12 : vector<8x256xf32>
    %14 = arith.mulf %8, %11 : vector<8x256xf32>
    %15 = arith.select %13, %11, %14 : vector<8x256xi1>, vector<8x256xf32>
    %cst_6 = arith.constant 0.000000e+00 : f32
    %16 = vector.broadcast %cst_6 : f32 to vector<8x256xf32>
    %17 = arith.maximumf %3, %16 : vector<8x256xf32>
    %18 = arith.mulf %3, %4 : vector<8x256xf32>
    %19 = arith.subf %17, %18 : vector<8x256xf32>
    %cst_7 = arith.constant 1.000000e+00 : f32
    %20 = vector.broadcast %cst_7 : f32 to vector<8x256xf32>
    %21 = arith.addf %20, %8 : vector<8x256xf32>
    %22 = math.log %21 : vector<8x256xf32>
    %23 = arith.addf %19, %22 : vector<8x256xf32>
    %c0_8 = arith.constant 0 : index
    %c0_9 = arith.constant 0 : index
    %24 = vector.load %arg8[%c0_8, %c0_9] : memref<8x256xf32, #tpu.memory_space<vmem>>, vector<8x256xf32>
    %25 = arith.mulf %15, %4 : vector<8x256xf32>
    %26 = arith.addf %24, %25 : vector<8x256xf32>
    %c0_10 = arith.constant 0 : index
    %c0_11 = arith.constant 0 : index
    %27 = vector.load %arg8[%c0_10, %c0_11] : memref<8x256xf32, #tpu.memory_space<vmem>>, vector<8x256xf32>
    tpu.vector_store %arg8[%c0_10, %c0_11], %26 {strides = array<i32>} : memref<8x256xf32, #tpu.memory_space<vmem>>, vector<8x256xf32>,
    %c0_12 = arith.constant 0 : index
    %c0_13 = arith.constant 0 : index
    %28 = vector.load %arg9[%c0_12, %c0_13] : memref<8x256xf32, #tpu.memory_space<vmem>>, vector<8x256xf32>
    %29 = arith.addf %28, %15 : vector<8x256xf32>
    %c0_14 = arith.constant 0 : index
    %c0_15 = arith.constant 0 : index
    %30 = vector.load %arg9[%c0_14, %c0_15] : memref<8x256xf32, #tpu.memory_space<vmem>>, vector<8x256xf32>
    tpu.vector_store %arg9[%c0_14, %c0_15], %29 {strides = array<i32>} : memref<8x256xf32, #tpu.memory_space<vmem>>, vector<8x256xf32>,
    %c0_16 = arith.constant 0 : index
    %c0_17 = arith.constant 0 : index
    %31 = vector.load %arg10[%c0_16, %c0_17] : memref<8x256xf32, #tpu.memory_space<vmem>>, vector<8x256xf32>
    %32 = arith.addf %31, %4 : vector<8x256xf32>
    %c0_18 = arith.constant 0 : index
    %c0_19 = arith.constant 0 : index
    %33 = vector.load %arg10[%c0_18, %c0_19] : memref<8x256xf32, #tpu.memory_space<vmem>>, vector<8x256xf32>
    tpu.vector_store %arg10[%c0_18, %c0_19], %32 {strides = array<i32>} : memref<8x256xf32, #tpu.memory_space<vmem>>, vector<8x256xf32>,
    %c0_20 = arith.constant 0 : index
    %c0_21 = arith.constant 0 : index
    %34 = vector.load %arg11[%c0_20, %c0_21] : memref<8x256xf32, #tpu.memory_space<vmem>>, vector<8x256xf32>
    %35 = arith.addf %34, %23 : vector<8x256xf32>
    %c0_22 = arith.constant 0 : index
    %c0_23 = arith.constant 0 : index
    %36 = vector.load %arg11[%c0_22, %c0_23] : memref<8x256xf32, #tpu.memory_space<vmem>>, vector<8x256xf32>
    tpu.vector_store %arg11[%c0_22, %c0_23], %35 {strides = array<i32>} : memref<8x256xf32, #tpu.memory_space<vmem>>, vector<8x256xf32>,
    %c0_i32_24 = arith.constant 0 : i32
    %37 = arith.cmpi eq, %arg1, %c0_i32_24 : i32
    %38 = arith.extui %37 : i1 to i32
    %c0_i32_25 = arith.constant 0 : i32
    %39 = arith.cmpi ne, %38, %c0_i32_25 : i32
    scf.if %39 {
      %c0_26 = arith.constant 0 : index
      %c0_27 = arith.constant 0 : index
      %40 = vector.load %arg8[%c0_26, %c0_27] : memref<8x256xf32, #tpu.memory_space<vmem>>, vector<8x256xf32>
      %cst_28 = arith.constant dense<0.000000e+00> : vector<8xf32>
      %41 = vector.multi_reduction <add>, %40, %cst_28 [1] : vector<8x256xf32> to vector<8xf32>
      %42 = vector.shape_cast %41 : vector<8xf32> to vector<8x1xf32>
      %c0_29 = arith.constant 0 : index
      %c0_30 = arith.constant 0 : index
      %43 = vector.load %arg4[%c0_29, %c0_30] : memref<8x1xf32, #tpu.memory_space<vmem>>, vector<8x1xf32>
      tpu.vector_store %arg4[%c0_29, %c0_30], %42 {strides = array<i32>} : memref<8x1xf32, #tpu.memory_space<vmem>>, vector<8x1xf32>,
      %c0_31 = arith.constant 0 : index
      %c0_32 = arith.constant 0 : index
      %44 = vector.load %arg9[%c0_31, %c0_32] : memref<8x256xf32, #tpu.memory_space<vmem>>, vector<8x256xf32>
      %cst_33 = arith.constant dense<0.000000e+00> : vector<8xf32>
      %45 = vector.multi_reduction <add>, %44, %cst_33 [1] : vector<8x256xf32> to vector<8xf32>
      %46 = vector.shape_cast %45 : vector<8xf32> to vector<8x1xf32>
      %c0_34 = arith.constant 0 : index
      %c0_35 = arith.constant 0 : index
      %47 = vector.load %arg5[%c0_34, %c0_35] : memref<8x1xf32, #tpu.memory_space<vmem>>, vector<8x1xf32>
      tpu.vector_store %arg5[%c0_34, %c0_35], %46 {strides = array<i32>} : memref<8x1xf32, #tpu.memory_space<vmem>>, vector<8x1xf32>,
      %c0_36 = arith.constant 0 : index
      %c0_37 = arith.constant 0 : index
      %48 = vector.load %arg10[%c0_36, %c0_37] : memref<8x256xf32, #tpu.memory_space<vmem>>, vector<8x256xf32>
      %cst_38 = arith.constant dense<0.000000e+00> : vector<8xf32>
      %49 = vector.multi_reduction <add>, %48, %cst_38 [1] : vector<8x256xf32> to vector<8xf32>
      %50 = vector.shape_cast %49 : vector<8xf32> to vector<8x1xf32>
      %c0_39 = arith.constant 0 : index
      %c0_40 = arith.constant 0 : index
      %51 = vector.load %arg6[%c0_39, %c0_40] : memref<8x1xf32, #tpu.memory_space<vmem>>, vector<8x1xf32>
      tpu.vector_store %arg6[%c0_39, %c0_40], %50 {strides = array<i32>} : memref<8x1xf32, #tpu.memory_space<vmem>>, vector<8x1xf32>,
      %c0_41 = arith.constant 0 : index
      %c0_42 = arith.constant 0 : index
      %52 = vector.load %arg11[%c0_41, %c0_42] : memref<8x256xf32, #tpu.memory_space<vmem>>, vector<8x256xf32>
      %cst_43 = arith.constant dense<0.000000e+00> : vector<8xf32>
      %53 = vector.multi_reduction <add>, %52, %cst_43 [1] : vector<8x256xf32> to vector<8xf32>
      %54 = vector.shape_cast %53 : vector<8xf32> to vector<8x1xf32>
      %c0_44 = arith.constant 0 : index
      %c0_45 = arith.constant 0 : index
      %55 = vector.load %arg7[%c0_44, %c0_45] : memref<8x1xf32, #tpu.memory_space<vmem>>, vector<8x1xf32>
      tpu.vector_store %arg7[%c0_44, %c0_45], %54 {strides = array<i32>} : memref<8x1xf32, #tpu.memory_space<vmem>>, vector<8x1xf32>,
    } else {
    }
    return
  }
  func.func @transform_0(%arg0: i32, %arg1: i32) -> (i32, i32) {
    %c0_i32 = arith.constant 0 : i32
    return %arg0, %arg1 : i32, i32
  }
  func.func @transform_1(%arg0: i32, %arg1: i32) -> (i32, i32) {
    %c0_i32 = arith.constant 0 : i32
    return %arg0, %arg1 : i32, i32
  }
  func.func @transform_2(%arg0: i32, %arg1: i32) -> (i32, i32) {
    %c0_i32 = arith.constant 0 : i32
    %c0_i32_0 = arith.constant 0 : i32
    return %arg0, %c0_i32 : i32, i32
  }
  func.func @transform_3(%arg0: i32, %arg1: i32) -> (i32, i32) {
    %c0_i32 = arith.constant 0 : i32
    %c0_i32_0 = arith.constant 0 : i32
    return %arg0, %c0_i32 : i32, i32
  }
  func.func @transform_4(%arg0: i32, %arg1: i32) -> (i32, i32) {
    %c0_i32 = arith.constant 0 : i32
    %c0_i32_0 = arith.constant 0 : i32
    return %arg0, %c0_i32 : i32, i32
  }
  func.func @transform_5(%arg0: i32, %arg1: i32) -> (i32, i32) {
    %c0_i32 = arith.constant 0 : i32
    %c0_i32_0 = arith.constant 0 : i32
    return %arg0, %c0_i32 : i32, i32
  }
}

</mosaic_0001>

<bundles_post_ra>
// kernel: dice_bce_loss.1
= control target key start
LH: loop header
LB: loop body
LE: loop exit
PB: predicated region body
PF: predicated region fallthrough
CT: control target
= control target key end

     0   :  { %vm95_vm2 = vcmask 7168   ;;  %s197_s1 = inlined_call_operand.vmem [shape: f32[8,256], index: 1, kind: input, shape index: {}]   ;;  %s198_s0 = inlined_call_operand.vmem [shape: f32[8,256], index: 0, kind: input, shape index: {}]   ;;  %s199_s4 = inlined_call_operand.vmem [shape: f32[8,1], index: 4, kind: output, shape index: {2}]   ;;  %s200_s2 = inlined_call_operand.vmem [shape: f32[8,1], index: 2, kind: output, shape index: {0}]   ;;  %s201_s5 = inlined_call_operand.vmem [shape: f32[8,1], index: 5, kind: output, shape index: {3}]   ;;  %s202_s3 = inlined_call_operand.vmem [shape: f32[8,1], index: 3, kind: output, shape index: {1}]  }
   0x1   :  { %v29_v0 = vld [vmem:[%s197_s1] sm:$0xff]  ;;  %v30_v1 = vld [vmem:[%s197_s1 + $0x8] sm:$0xff] }
   0x2   :  { %v27_v2 = vld [vmem:[%s198_s0] sm:$0xff]  ;;  %v105_v3 = vadd.f32 %v30_v1, %v29_v0  ;;  %v28_v4 = vld [vmem:[%s198_s0 + $0x8] sm:$0xff] }
   0x3   :  { %v31_v5 = vand.u32 2147483647, %v27_v2  ;;  %v32_v6 = vand.u32 2147483647, %v28_v4  ;;  %v51_v15 = vmul.f32 %v29_v0, %v27_v2  ;;  %v49_v16 = vmax.f32 %v27_v2, 0.0 }
   0x4   :  { %106 = vadd.xlane.f32.xlu1 %v105_v3  ;;  %v52_v17 = vmul.f32 %v30_v1, %v28_v4  ;;  %v50_v18 = vmax.f32 %v28_v4, 0.0  ;;  %vm43_vm0 = vcmp.ge.f32.partialorder %v27_v2, 0.0  ;;  %vm44_vm1 = vcmp.ge.f32.partialorder %v28_v4, 0.0 }
   0x5   :  { %v33_v7 = vsub.f32 0.0, %v31_v5  ;;  %v34_v8 = vsub.f32 0.0, %v32_v6  ;;  %v53_v22 = vsub.f32 %v49_v16, %v51_v15 }
   0x6   :  { %v54_v25 = vsub.f32 %v50_v18, %v52_v17 }
   0x7   :  { %v35_v9 = vmul.f32 1.442695, %v33_v7  ;;  %v37_v10 = vmul.f32 1.442695, %v34_v8 }
   0x9   :  { %131 = vpow2.f32 %v35_v9 }
   0xa   :  { %133 = vpow2.f32 %v37_v10 }
  0x13   :  { %v132_v11 = vpop.eup %131 }
  0x14   :  { %v134_v12 = vpop.eup %133  ;;  %v39_v13 = vadd.f32 1.0, %v132_v11 }
  0x15   :  { %v40_v14 = vadd.f32 1.0, %v134_v12 }
  0x16   :  { %135 = vrcp.f32 %v39_v13 }
  0x17   :  { %137 = vrcp.f32 %v40_v14 }
  0x18   :  { %139 = vlog2.f32 %v39_v13 }
  0x19   :  { %141 = vlog2.f32 %v40_v14 }
  0x20   :  { %v136_v19 = vpop.eup %135 }
  0x21   :  { %v138_v20 = vpop.eup %137  ;;  %v45_v21 = vmul.f32 %v136_v19, %v132_v11 }
  0x22   :  { %v140_v23 = vpop.eup %139  ;;  %v46_v24 = vmul.f32 %v138_v20, %v134_v12 }
  0x23   :  { %v142_v26 = vpop.eup %141  ;;  %v47_v27 = vsel %vm43_vm0, %v136_v19, %v45_v21  ;;  %v56_v28 = vmul.f32 0.6931472, %v140_v23 }
  0x24   :  { %v48_v29 = vsel %vm44_vm1, %v138_v20, %v46_v24  ;;  %v63_v30 = vmul.f32 %v47_v27, %v29_v0  ;;  %v58_v31 = vmul.f32 0.6931472, %v142_v26 }
  0x25   :  { %v64_v32 = vmul.f32 %v48_v29, %v30_v1  ;;  %v59_v33 = vadd.f32 %v56_v28, %v53_v22  ;;  %v99_v37 = vadd.f32 %v48_v29, %v47_v27 }
  0x26   :  { %v60_v34 = vadd.f32 %v58_v31, %v54_v25 }
  0x27   :  { %v92_v35 = vadd.f32 %v64_v32, %v63_v30 }
  0x28   :  { %v111_v36 = vadd.f32 %v60_v34, %v59_v33 }
  0x29   :  { %93 = vadd.xlane.f32.xlu0 %v92_v35 }
  0x2a   :  { %112 = vadd.xlane.f32.xlu1 %v111_v36 }
  0x2d   :  { %100 = vadd.xlane.f32.xlu0 %v99_v37 }
  0x91   :  { %v107_v38 = vpop.xlane.xlu1 %106 }
  0x92   :  { %108 = vst.msk [vmem:[%s199_s4] sm:$0xff] %vm95_vm2, %v107_v38 }
  0xb6   :  { %v94_v39 = vpop.xlane.xlu0 %93 }
  0xb7   :  { %96 = vst.msk [vmem:[%s200_s2] sm:$0xff] %vm95_vm2, %v94_v39  ;;  %v113_v40 = vpop.xlane.xlu1 %112 }
  0xb8   :  { %114 = vst.msk [vmem:[%s201_s5] sm:$0xff] %vm95_vm2, %v113_v40 }
  0xba   :  { %v101_v41 = vpop.xlane.xlu0 %100 }
  0xbb   :  { %102 = vst.msk [vmem:[%s202_s3] sm:$0xff] %vm95_vm2, %v101_v41 }

</bundles_post_ra>
